<compile_context>
chip_gen: v5e
topology: v5e:2x2
jax: 0.10.0
libtpu: 0.0.40
codegen_flags: <defaults>
</compile_context>

<pallas_src>
import jax
import jax.numpy as jnp
import numpy as np
from jax.experimental import pallas as pl
from jax.experimental.pallas import tpu as pltpu

HIDDEN = 64
NEG_INF = -1e9


def _round_up(x, m):
    return ((x + m - 1) // m) * m


# ----------------------------------------------------------------------------
# Parameter init: orthogonal weights scaled by `std`, zero bias (layer_init).
# ----------------------------------------------------------------------------
def orthogonal(key, rows, cols, gain):
    a = jax.random.normal(key, (max(rows, cols), min(rows, cols)), jnp.float32)
    q, r = jnp.linalg.qr(a)
    q = q * jnp.sign(jnp.diagonal(r))
    if rows < cols:
        q = q.T
    return (gain * q[:rows, :cols]).astype(jnp.float32)


def make_actor_params(key, obs_size, action_size):
    k1, k2, k3 = jax.random.split(key, 3)
    std = float(np.sqrt(2.0))
    w1 = orthogonal(k1, obs_size, HIDDEN, std)
    b1 = jnp.zeros((1, HIDDEN), jnp.float32)
    w2 = orthogonal(k2, HIDDEN, HIDDEN, std)
    b2 = jnp.zeros((1, HIDDEN), jnp.float32)
    w3 = orthogonal(k3, HIDDEN, action_size, 0.01)
    b3 = jnp.zeros((1, action_size), jnp.float32)
    return (w1, b1, w2, b2, w3, b3)


# ----------------------------------------------------------------------------
# Pallas kernel: actor MLP (bf16 matmuls, f32 accum) + Gumbel-max sampling.
# ----------------------------------------------------------------------------
def ppo_actor_kernel(x_ref, g_ref, w1_ref, b1_ref, w2_ref, b2_ref, w3_ref,
                     b3_ref, action_ref, logits_ref):
    bf16 = jnp.bfloat16
    x = x_ref[...]                                   # already bf16
    h1 = jnp.tanh(jnp.dot(x, w1_ref[...],
                          preferred_element_type=jnp.float32) + b1_ref[...])
    h2 = jnp.tanh(jnp.dot(h1.astype(bf16), w2_ref[...],
                          preferred_element_type=jnp.float32) + b2_ref[...])
    logits = (jnp.dot(h2.astype(bf16), w3_ref[...],
                      preferred_element_type=jnp.float32) + b3_ref[...])
    logits_ref[...] = logits                         # lane-dense (128-wide) store

    # Categorical(logits).sample()  ==  argmax(logits + Gumbel noise).
    # Padded action columns carry a -1e9 bias, so they never win the argmax.
    z = logits + g_ref[...]
    n = z.shape[-1]
    col = jax.lax.broadcasted_iota(jnp.int32, z.shape, 1)
    zmax = jnp.max(z, axis=-1, keepdims=True)
    action = jnp.min(jnp.where(z >= zmax, col, n), axis=-1, keepdims=True)
    action_ref[...] = jnp.broadcast_to(action, action_ref.shape)


# ----------------------------------------------------------------------------
# Wrapper: padding / tiling / pallas_call plumbing.
# ----------------------------------------------------------------------------
@jax.jit
def ppo_forward(key, x, w1, b1, w2, b2, w3, b3):
    batch, obs_size = x.shape
    action_size = w3.shape[1]

    # Batch tile: multiple of 8, capped at 512 (comfortably within v7x's
    # 32 MiB default scoped VMEM with double-buffering of the x/gumbel tiles).
    tm = min(512, _round_up(batch, 8))
    b_pad = _round_up(batch, tm)
    n_tiles = b_pad // tm

    # Lane-dense action dimension (multiple of 128).
    a_pad = _round_up(max(action_size, 1), 128)

    bf16 = jnp.bfloat16
    x_p = jnp.pad(x, ((0, b_pad - batch), (0, 0))).astype(bf16)
    gumbel = jax.random.gumbel(key, (b_pad, a_pad), jnp.float32)

    w3_p = jnp.pad(w3, ((0, 0), (0, a_pad - action_size)))
    b3_p = jnp.pad(b3, ((0, 0), (0, a_pad - action_size)),
                   constant_values=NEG_INF)
    w1b, w2b, w3b = w1.astype(bf16), w2.astype(bf16), w3_p.astype(bf16)

    const = lambda i: (0, 0)    # weights/biases stay VMEM-resident
    rowblk = lambda i: (i, 0)   # batch-tiled arrays

    flops = 2 * b_pad * (obs_size * HIDDEN + HIDDEN * HIDDEN + HIDDEN * a_pad)
    transcendentals = b_pad * 2 * HIDDEN
    bytes_accessed = (b_pad * obs_size * 2 + b_pad * a_pad * 4          # x, gumbel
                      + (obs_size * HIDDEN + HIDDEN * HIDDEN + HIDDEN * a_pad) * 2
                      + (2 * HIDDEN + a_pad) * 4                        # biases
                      + b_pad * a_pad * 8)                              # outputs

    action, logits = pl.pallas_call(
        ppo_actor_kernel,
        out_shape=(
            jax.ShapeDtypeStruct((b_pad, a_pad), jnp.int32),
            jax.ShapeDtypeStruct((b_pad, a_pad), jnp.float32),
        ),
        grid=(n_tiles,),
        in_specs=[
            pl.BlockSpec((tm, obs_size), rowblk),
            pl.BlockSpec((tm, a_pad), rowblk),
            pl.BlockSpec((obs_size, HIDDEN), const),
            pl.BlockSpec((1, HIDDEN), const),
            pl.BlockSpec((HIDDEN, HIDDEN), const),
            pl.BlockSpec((1, HIDDEN), const),
            pl.BlockSpec((HIDDEN, a_pad), const),
            pl.BlockSpec((1, a_pad), const),
        ],
        out_specs=(
            pl.BlockSpec((tm, a_pad), rowblk),
            pl.BlockSpec((tm, a_pad), rowblk),
        ),
        compiler_params=pltpu.CompilerParams(
            dimension_semantics=("parallel",)),
        cost_estimate=pl.CostEstimate(
            flops=flops, transcendentals=transcendentals,
            bytes_accessed=bytes_accessed),
    )(x_p, gumbel, w1b, b1, w2b, b2, w3b, b3_p)

    return action[:batch, 0], logits[:batch, :action_size]


# ----------------------------------------------------------------------------
# Pure-JAX reference (same bf16-in / f32-accum math).
# ----------------------------------------------------------------------------
def reference_logits(x, w1, b1, w2, b2, w3, b3):
    bf16, f32 = jnp.bfloat16, jnp.float32
    h1 = jnp.tanh(jnp.dot(x.astype(bf16), w1.astype(bf16),
                          preferred_element_type=f32) + b1)
    h2 = jnp.tanh(jnp.dot(h1.astype(bf16), w2.astype(bf16),
                          preferred_element_type=f32) + b2)
    return jnp.dot(h2.astype(bf16), w3.astype(bf16),
                   preferred_element_type=f32) + b3


if __name__ == "__main__":
    batch, obs_size, action_size = 4, 16, 6

    key = jax.random.PRNGKey(0)
    k_x, k_p, k_s = jax.random.split(key, 3)
    x = jax.random.normal(k_x, (batch, obs_size), jnp.float32)
    params = make_actor_params(k_p, obs_size, action_size)

    action, logits = ppo_forward(k_s, x, *params)
    action = jax.block_until_ready(action)
    logits = jax.block_until_ready(logits)

    ref = reference_logits(x, *params)
    assert action.shape == (batch,) and action.dtype == jnp.int32
    assert bool(jnp.all((action >= 0) & (action < action_size)))
    np.testing.assert_allclose(np.asarray(logits), np.asarray(ref),
                               rtol=1e-2, atol=1e-2)
    print("KERNEL_OK")
</pallas_src>

<mosaic_0001>
module attributes {stable_mosaic.version = 11 : i64} {
  func.func @ppo_actor_kernel(%arg0: i32, %arg1: memref<8x16xbf16, #tpu.memory_space<vmem>>, %arg2: memref<8x128xf32, #tpu.memory_space<vmem>>, %arg3: memref<16x64xbf16, #tpu.memory_space<vmem>>, %arg4: memref<1x64xf32, #tpu.memory_space<vmem>>, %arg5: memref<64x64xbf16, #tpu.memory_space<vmem>>, %arg6: memref<1x64xf32, #tpu.memory_space<vmem>>, %arg7: memref<64x128xbf16, #tpu.memory_space<vmem>>, %arg8: memref<1x128xf32, #tpu.memory_space<vmem>>, %arg9: memref<8x128xi32, #tpu.memory_space<vmem>>, %arg10: memref<8x128xf32, #tpu.memory_space<vmem>>) attributes {dimension_semantics = [#tpu.dimension_semantics<parallel>], iteration_bounds = array<i64: 1>, scalar_prefetch = 0 : i64, scratch_operands = 0 : i64, tpu.core_type = #tpu.core_type<tc>, window_params = [{transform_indices = @transform_0, window_bounds = array<i64: 8, 16>}, {transform_indices = @transform_1, window_bounds = array<i64: 8, 128>}, {pipeline_mode = #tpu.pipeline_mode<synchronous>, transform_indices = @transform_2, window_bounds = array<i64: 16, 64>}, {pipeline_mode = #tpu.pipeline_mode<synchronous>, transform_indices = @transform_3, window_bounds = array<i64: 1, 64>}, {pipeline_mode = #tpu.pipeline_mode<synchronous>, transform_indices = @transform_4, window_bounds = array<i64: 64, 64>}, {pipeline_mode = #tpu.pipeline_mode<synchronous>, transform_indices = @transform_5, window_bounds = array<i64: 1, 64>}, {pipeline_mode = #tpu.pipeline_mode<synchronous>, transform_indices = @transform_6, window_bounds = array<i64: 64, 128>}, {pipeline_mode = #tpu.pipeline_mode<synchronous>, transform_indices = @transform_7, window_bounds = array<i64: 1, 128>}, {transform_indices = @transform_8, window_bounds = array<i64: 8, 128>}, {transform_indices = @transform_9, window_bounds = array<i64: 8, 128>}]} {
    %c0 = arith.constant 0 : index
    %c0_0 = arith.constant 0 : index
    %0 = vector.load %arg1[%c0, %c0_0] : memref<8x16xbf16, #tpu.memory_space<vmem>>, vector<8x16xbf16>
    %c0_1 = arith.constant 0 : index
    %c0_2 = arith.constant 0 : index
    %1 = vector.load %arg3[%c0_1, %c0_2] : memref<16x64xbf16, #tpu.memory_space<vmem>>, vector<16x64xbf16>
    %cst = arith.constant dense<0.000000e+00> : vector<8x64xf32>
    %2 = tpu.matmul %0, %1, %cst {dimension_numbers = #tpu.dot_dimension_numbers<[1], [0], [0], [1], [0, 0, 1, 1], [], []>} : vector<8x16xbf16>, vector<16x64xbf16>, vector<8x64xf32> -> vector<8x64xf32>
    %c0_3 = arith.constant 0 : index
    %c0_4 = arith.constant 0 : index
    %3 = vector.load %arg4[%c0_3, %c0_4] : memref<1x64xf32, #tpu.memory_space<vmem>>, vector<1x64xf32>
    %4 = vector.broadcast %3 : vector<1x64xf32> to vector<8x64xf32>
    %5 = arith.addf %2, %4 : vector<8x64xf32>
    %6 = math.tanh %5 : vector<8x64xf32>
    %7 = arith.truncf %6 : vector<8x64xf32> to vector<8x64xbf16>
    %c0_5 = arith.constant 0 : index
    %c0_6 = arith.constant 0 : index
    %8 = vector.load %arg5[%c0_5, %c0_6] : memref<64x64xbf16, #tpu.memory_space<vmem>>, vector<64x64xbf16>
    %cst_7 = arith.constant dense<0.000000e+00> : vector<8x64xf32>
    %9 = tpu.matmul %7, %8, %cst_7 {dimension_numbers = #tpu.dot_dimension_numbers<[1], [0], [0], [1], [0, 0, 1, 1], [], []>} : vector<8x64xbf16>, vector<64x64xbf16>, vector<8x64xf32> -> vector<8x64xf32>
    %c0_8 = arith.constant 0 : index
    %c0_9 = arith.constant 0 : index
    %10 = vector.load %arg6[%c0_8, %c0_9] : memref<1x64xf32, #tpu.memory_space<vmem>>, vector<1x64xf32>
    %11 = vector.broadcast %10 : vector<1x64xf32> to vector<8x64xf32>
    %12 = arith.addf %9, %11 : vector<8x64xf32>
    %13 = math.tanh %12 : vector<8x64xf32>
    %14 = arith.truncf %13 : vector<8x64xf32> to vector<8x64xbf16>
    %c0_10 = arith.constant 0 : index
    %c0_11 = arith.constant 0 : index
    %15 = vector.load %arg7[%c0_10, %c0_11] : memref<64x128xbf16, #tpu.memory_space<vmem>>, vector<64x128xbf16>
    %cst_12 = arith.constant dense<0.000000e+00> : vector<8x128xf32>
    %16 = tpu.matmul %14, %15, %cst_12 {dimension_numbers = #tpu.dot_dimension_numbers<[1], [0], [0], [1], [0, 0, 1, 1], [], []>} : vector<8x64xbf16>, vector<64x128xbf16>, vector<8x128xf32> -> vector<8x128xf32>
    %c0_13 = arith.constant 0 : index
    %c0_14 = arith.constant 0 : index
    %17 = vector.load %arg8[%c0_13, %c0_14] : memref<1x128xf32, #tpu.memory_space<vmem>>, vector<1x128xf32>
    %18 = vector.broadcast %17 : vector<1x128xf32> to vector<8x128xf32>
    %19 = arith.addf %16, %18 : vector<8x128xf32>
    %c0_15 = arith.constant 0 : index
    %c0_16 = arith.constant 0 : index
    %20 = vector.load %arg10[%c0_15, %c0_16] : memref<8x128xf32, #tpu.memory_space<vmem>>, vector<8x128xf32>
    tpu.vector_store %arg10[%c0_15, %c0_16], %19 {strides = array<i32>} : memref<8x128xf32, #tpu.memory_space<vmem>>, vector<8x128xf32>,
    %c0_17 = arith.constant 0 : index
    %c0_18 = arith.constant 0 : index
    %21 = vector.load %arg2[%c0_17, %c0_18] : memref<8x128xf32, #tpu.memory_space<vmem>>, vector<8x128xf32>
    %22 = arith.addf %19, %21 : vector<8x128xf32>
    %23 = tpu.iota {dimensions = array<i32: 1>} : vector<8x128xi32>
    %cst_19 = arith.constant dense<0xFF800000> : vector<8xf32>
    %24 = vector.multi_reduction <maximumf>, %22, %cst_19 [1] : vector<8x128xf32> to vector<8xf32>
    %25 = vector.shape_cast %24 : vector<8xf32> to vector<8x1xf32>
    %26 = vector.broadcast %25 : vector<8x1xf32> to vector<8x128xf32>
    %27 = arith.cmpf oge, %22, %26 : vector<8x128xf32>
    %c128_i32 = arith.constant 128 : i32
    %28 = vector.broadcast %c128_i32 : i32 to vector<8x128xi32>
    %29 = arith.select %27, %23, %28 : vector<8x128xi1>, vector<8x128xi32>
    %cst_20 = arith.constant dense<2147483647> : vector<8xi32>
    %30 = vector.multi_reduction <minsi>, %29, %cst_20 [1] : vector<8x128xi32> to vector<8xi32>
    %31 = vector.shape_cast %30 : vector<8xi32> to vector<8x1xi32>
    %32 = vector.shape_cast %31 : vector<8x1xi32> to vector<8x1xi32>
    %33 = vector.broadcast %32 : vector<8x1xi32> to vector<8x128xi32>
    %c0_21 = arith.constant 0 : index
    %c0_22 = arith.constant 0 : index
    %34 = vector.load %arg9[%c0_21, %c0_22] : memref<8x128xi32, #tpu.memory_space<vmem>>, vector<8x128xi32>
    tpu.vector_store %arg9[%c0_21, %c0_22], %33 {strides = array<i32>} : memref<8x128xi32, #tpu.memory_space<vmem>>, vector<8x128xi32>,
    return
  }
  func.func @transform_0(%arg0: i32) -> (i32, i32) {
    %c0_i32 = arith.constant 0 : i32
    %c0_i32_0 = arith.constant 0 : i32
    return %arg0, %c0_i32 : i32, i32
  }
  func.func @transform_1(%arg0: i32) -> (i32, i32) {
    %c0_i32 = arith.constant 0 : i32
    %c0_i32_0 = arith.constant 0 : i32
    return %arg0, %c0_i32 : i32, i32
  }
  func.func @transform_2(%arg0: i32) -> (i32, i32) {
    %c0_i32 = arith.constant 0 : i32
    %c0_i32_0 = arith.constant 0 : i32
    %c0_i32_1 = arith.constant 0 : i32
    return %c0_i32, %c0_i32_0 : i32, i32
  }
  func.func @transform_3(%arg0: i32) -> (i32, i32) {
    %c0_i32 = arith.constant 0 : i32
    %c0_i32_0 = arith.constant 0 : i32
    %c0_i32_1 = arith.constant 0 : i32
    return %c0_i32, %c0_i32_0 : i32, i32
  }
  func.func @transform_4(%arg0: i32) -> (i32, i32) {
    %c0_i32 = arith.constant 0 : i32
    %c0_i32_0 = arith.constant 0 : i32
    %c0_i32_1 = arith.constant 0 : i32
    return %c0_i32, %c0_i32_0 : i32, i32
  }
  func.func @transform_5(%arg0: i32) -> (i32, i32) {
    %c0_i32 = arith.constant 0 : i32
    %c0_i32_0 = arith.constant 0 : i32
    %c0_i32_1 = arith.constant 0 : i32
    return %c0_i32, %c0_i32_0 : i32, i32
  }
  func.func @transform_6(%arg0: i32) -> (i32, i32) {
    %c0_i32 = arith.constant 0 : i32
    %c0_i32_0 = arith.constant 0 : i32
    %c0_i32_1 = arith.constant 0 : i32
    return %c0_i32, %c0_i32_0 : i32, i32
  }
  func.func @transform_7(%arg0: i32) -> (i32, i32) {
    %c0_i32 = arith.constant 0 : i32
    %c0_i32_0 = arith.constant 0 : i32
    %c0_i32_1 = arith.constant 0 : i32
    return %c0_i32, %c0_i32_0 : i32, i32
  }
  func.func @transform_8(%arg0: i32) -> (i32, i32) {
    %c0_i32 = arith.constant 0 : i32
    %c0_i32_0 = arith.constant 0 : i32
    return %arg0, %c0_i32 : i32, i32
  }
  func.func @transform_9(%arg0: i32) -> (i32, i32) {
    %c0_i32 = arith.constant 0 : i32
    %c0_i32_0 = arith.constant 0 : i32
    return %arg0, %c0_i32 : i32, i32
  }
}

</mosaic_0001>

<bundles_post_ra>
// kernel: ppo_forward.1
= control target key start
LH: loop header
LB: loop body
LE: loop exit
PB: predicated region body
PF: predicated region fallthrough
CT: control target
= control target key end

     0   :  { %vm45_vm0 = vcmask 130048   ;;  %vm100_vm1 = vcmask 523264   ;;  %v174_v28 = vlaneseq  ;;  %s358_s2 = inlined_call_operand.vmem [shape: bf16[16,64], index: 2, kind: input, shape index: {}]   ;;  %s359_s0 = inlined_call_operand.vmem [shape: bf16[8,16], index: 0, kind: input, shape index: {}]   ;;  %s360_s4 = inlined_call_operand.vmem [shape: bf16[64,64], index: 4, kind: input, shape index: {}]   ;;  %s361_s3 = inlined_call_operand.vmem [shape: f32[1,64], index: 3, kind: input, shape index: {}]   ;;  %s362_s5 = inlined_call_operand.vmem [shape: f32[1,64], index: 5, kind: input, shape index: {}]   ;;  %s363_s6 = inlined_call_operand.vmem [shape: bf16[64,128], index: 6, kind: input, shape index: {}]   ;;  %s364_s7 = inlined_call_operand.vmem [shape: f32[1,128], index: 7, kind: input, shape index: {}]   ;;  %s365_s1 = inlined_call_operand.vmem [shape: f32[8,128], index: 1, kind: input, shape index: {}]   ;;  %s366_s9 = inlined_call_operand.vmem [shape: f32[8,128], index: 9, kind: output, shape index: {1}]   ;;  %s367_s8 = inlined_call_operand.vmem [shape: s32[8,128], index: 8, kind: output, shape index: {0}]  }
   0x1   :  { %v242_v0 = vld [vmem:[%s358_s2] sm:$0xff]  ;;  %v246_v1 = vld [vmem:[%s360_s4 + $0x18] sm:$0xff]  ;;  %v245_v3 = vld [vmem:[%s360_s4 + $0x10] sm:$0xff] }
   0x2   :  { %56 = vmatpush.bf16.msra.mxu0 %v242_v0  ;;  %v32_v2 = vld [vmem:[%s359_s0] sm:$0xf]  ;;  %108 = vmatpush.bf16.msra.mxu1 %v246_v1  ;;  %v244_v4 = vld [vmem:[%s360_s4 + $0x8] sm:$0xff]  ;;  %v250_v6 = vld [vmem:[%s363_s6 + $0x18] sm:$0xff]  ;;  %v175_v29 = vand.u32 127, %v174_v28 }
   0x3   :  { %v243_v5 = vld [vmem:[%s360_s4] sm:$0xff]  ;;  %162 = vmatpush.bf16.msra.mxu2 %v250_v6  ;;  %v249_v13 = vld [vmem:[%s363_s6 + $0x10] sm:$0xff]  ;;  %v248_v14 = vld [vmem:[%s363_s6 + $0x8] sm:$0xff] }
   0x4   :  { %v251_v7 = vld [vmem:[%s361_s3] ss:$0 sm:$0xff] }
   0x5   :  { %207 = vmatmul.msk.bf16.vlgmr.msra.gmra.mxu0 %vm45_vm0, %v32_v2  ;;  %v247_v15 = vld [vmem:[%s363_s6] sm:$0xff] }
   0x6   :  { %109 = vmatpush.bf16.msra.mxu1 %v245_v3  ;;  %v252_v16 = vld [vmem:[%s362_s5] ss:$0 sm:$0xff] }
   0x7   :  { %163 = vmatpush.bf16.msra.mxu2 %v249_v13  ;;  %v253_v22 = vld [vmem:[%s364_s7] ss:$0 sm:$0xff] }
   0x8   :  { %v172_v24 = vld [vmem:[%s365_s1] sm:$0xff] }
   0xa   :  { %110 = vmatpush.bf16.msra.mxu1 %v244_v4 }
   0xb   :  { %164 = vmatpush.bf16.msra.mxu2 %v248_v14 }
   0xe   :  { %111 = vmatpush.bf16.msra.mxu1 %v243_v5 }
   0xf   :  { %165 = vmatpush.bf16.msra.mxu2 %v247_v15 }
  0x82   :  { %v58_v8 = vpop.f32.mrf.mxu0 }
  0x83   :  { %v59_v9 = vadd.f32 %v251_v7, %v58_v8 }
  0x85   :  { %254 = vtanh.f32 %v59_v9 }
  0x8a   :  { %v60_v10 = vpop.f32.mrf.mxu0 }
  0x8b   :  { %v255_v11 = vpop.eup %254 }
  0x8c   :  { %v63_v12 = vpack.c.bf16 %v255_v11, %v255_v11 }
  0x8e   :  { %224 = vmatmul.msk.bf16.vlgmr.msra.gmra.mxu1 %vm100_vm1, %v63_v12 }
 0x10b   :  { %v113_v17 = vpop.f32.mrf.mxu1 }
 0x10c   :  { %v114_v18 = vadd.f32 %v252_v16, %v113_v17 }
 0x10e   :  { %256 = vtanh.f32 %v114_v18 }
 0x113   :  { %v115_v19 = vpop.f32.mrf.mxu1 }
 0x114   :  { %v257_v20 = vpop.eup %256 }
 0x115   :  { %v118_v21 = vpack.c.bf16 %v257_v20, %v257_v20 }
 0x117   :  { %241 = vmatmul.msk.bf16.vlgmr.msra.gmra.mxu2 %vm100_vm1, %v118_v21 }
 0x19a   :  { %v167_v23 = vpop.f32.mrf.mxu2 }
 0x19b   :  { %v168_v25 = vadd.f32 %v253_v22, %v167_v23 }
 0x19d   :  { %171 = vst [vmem:[%s366_s9] sm:$0xff] %v168_v25  ;;  %v173_v26 = vadd.f32 %v172_v24, %v168_v25 }
 0x19f   :  { %176 = vmax.xlane.f32.xlu0 %v173_v26 }
 0x1a2   :  { %v169_v27 = vpop.f32.mrf.mxu2 }
 0x212   :  { %v177_v30 = vpop.xlane.xlu0 %176 }
 0x213   :  { %vm178_vm2 = vcmp.ge.f32.partialorder %v173_v26, %v177_v30 }
 0x214   :  { %v179_v31 = vsel %vm178_vm2, %v175_v29, 128 }
 0x215   :  { %v181_v32 = vshra.s32 %v179_v31, 16  ;;  %v180_v34 = vand.u32 65535, %v179_v31 }
 0x217   :  { %v183_v33 = vcvt.s32.f32 %v181_v32  ;;  %v182_v36 = vcvt.s32.f32 %v180_v34 }
 0x219   :  { %184 = vmin.xlane.f32.xlu0 %v183_v33 }
 0x28c   :  { %v185_v35 = vpop.xlane.xlu0 %184 }
 0x28d   :  { %vm186_vm3 = vcmp.eq.f32.partialorder %v183_v33, %v185_v35  ;;  %v191_v38 = vcvt.f32.s32 %v185_v35 }
 0x28e   :  { %v187_v37 = vsel %vm186_vm3, %v182_v36, inf }
 0x28f   :  { %188 = vmin.xlane.f32.xlu1 %v187_v37  ;;  %v192_v40 = vshll.u32 %v191_v38, 16 }
 0x302   :  { %v189_v39 = vpop.xlane.xlu1 %188 }
 0x303   :  { %v190_v41 = vcvt.f32.s32 %v189_v39 }
 0x305   :  { %v193_v42 = vadd.s32 %v192_v40, %v190_v41 }
 0x307   :  { %194 = vst [vmem:[%s367_s8] sm:$0xff] %v193_v42 }

</bundles_post_ra>
